<compile_context>
chip_gen: v6e
topology: v6e:2x2x1
jax: 0.10.0
libtpu: 0.0.40
codegen_flags: <defaults>
</compile_context>

<pallas_src>
import functools

import numpy as np
import jax
import jax.numpy as jnp
from jax.experimental import pallas as pl
from jax.experimental.pallas import tpu as pltpu


# ----------------------------------------------------------------------------
# bior4.4 analysis filters (pywt.Wavelet('bior4.4').dec_lo / dec_hi),
# hardcoded deterministically (no checkpoint / pywt dependency).
# ----------------------------------------------------------------------------
BIOR44_DEC_LO = (
    0.0,
    0.03782845550726404,
    -0.023849465019556843,
    -0.11062440441843718,
    0.37740285561283066,
    0.8526986790088938,
    0.37740285561283066,
    -0.11062440441843718,
    -0.023849465019556843,
    0.03782845550726404,
)

BIOR44_DEC_HI = (
    0.0,
    -0.06453888262869706,
    0.04068941760916406,
    0.41809227322161724,
    -0.7884856164055829,
    0.41809227322161724,
    0.04068941760916406,
    -0.06453888262869706,
    0.0,
    0.0,
)


def _round_up(a, b):
    return -(-a // b) * b


# ----------------------------------------------------------------------------
# Host-side (numpy, float64) construction of the composite transform matrix.
# ----------------------------------------------------------------------------
def _make_level_matrix_f64(dec_lo, dec_hi, n_in):
    """Decimated circulant for one periodized AFB level (float64).

    (x @ M)[:n_in//2]  -> low-pass outputs,
    (x @ M)[n_in//2:]  -> high-pass outputs,
    matching afb1d's roll(-L//2) + strided conv + wrap-add for even n_in >= L.
    """
    L = len(dec_lo)
    L2 = L // 2
    n2 = n_in // 2
    assert n_in % 2 == 0, "signal length must be even at every level"
    assert n_in >= L, "signal length must be >= filter length at every level"
    M = np.zeros((n_in, n_in), dtype=np.float64)
    for n in range(n2):
        for j in range(L):
            src = (2 * n + L2 - j) % n_in
            M[src, n] += dec_lo[j]
            M[src, n2 + n] += dec_hi[j]
    return M


@functools.lru_cache(maxsize=16)
def _cached_composite_w(N, Np, J, dec_lo, dec_hi):
    """Composite (Np x Np) matrix (zero-padded from N x N) for the J-level WPT.

    x_row (1, N) @ W[:N, :N] = concatenation of the 2**J subbands (each of
    length N // 2**J) in the WPT1D output-channel order (channel 2c = low(c),
    2c+1 = high(c) at every level), so the kernel output only needs a reshape
    outside the kernel. Cached on-device so repeated calls pay neither the
    float64 host einsum nor the H2D transfer.
    """
    dec_lo = np.asarray(dec_lo, dtype=np.float64)
    dec_hi = np.asarray(dec_hi, dtype=np.float64)
    W = np.eye(N, dtype=np.float64)
    n_cur = N
    for _ in range(J):
        M = _make_level_matrix_f64(dec_lo, dec_hi, n_cur)
        n_sub = N // n_cur  # number of subbands (= 2**level)
        # Block-diagonal right-multiply: apply M to every length-n_cur segment.
        W = np.einsum('rsi,ij->rsj',
                      W.reshape(N, n_sub, n_cur), M).reshape(N, N)
        n_cur //= 2
    if Np != N:
        Wp = np.zeros((Np, Np), dtype=np.float64)
        Wp[:N, :N] = W
        W = Wp
    # TODO(synk): W is banded (~2**J * len(dec_lo) nonzeros per column); for
    # very large N a scalar-prefetched band-restricted K loop (or polyphase
    # form) would cut W HBM traffic by ~N/64x. Dense is fine at demo sizes.
    return jax.device_put(W.astype(np.float32))


# ----------------------------------------------------------------------------
# Pallas kernels.
# ----------------------------------------------------------------------------
def _wpt_matmul_kernel_full_k(x_ref, w_ref, o_ref):
    # Whole K in one block: no reduction axis, no accumulator.
    o_ref[...] = jnp.dot(x_ref[...], w_ref[...],
                         preferred_element_type=jnp.float32)


def _wpt_matmul_kernel_tiled_k(x_ref, w_ref, o_ref):
    # Accumulate directly into the resident f32 output block (no scratch).
    @pl.when(pl.program_id(2) == 0)
    def _():
        o_ref[...] = jnp.zeros_like(o_ref)

    o_ref[...] += jnp.dot(x_ref[...], w_ref[...],
                          preferred_element_type=jnp.float32)


# ----------------------------------------------------------------------------
# Tile / VMEM selection.
# ----------------------------------------------------------------------------
def _vmem_limit_bytes():
    """~3/4 of physical VMEM, capped at 96 MiB: ~48 MiB on v7x (64 MiB phys),
    ~96 MiB on v5e/v6e (128 MiB phys)."""
    try:
        cap = int(pltpu.get_tpu_info().vmem_capacity_bytes)
    except Exception:
        cap = 64 * 1024 * 1024  # conservative (v7x-sized) fallback
    return int(min(cap * 3 // 4, 96 * 1024 * 1024))


def _divisor_tiles(n, cands=(1024, 512, 256, 128)):
    ts = [t for t in cands if t <= n and n % t == 0]
    return ts if ts else [n]


def _select_tiles(TR, Np, budget):
    """Return (TK, TN, tiled_k). Estimates double-buffered VMEM usage."""
    def fits(tk, tn):
        # x block + W block double-buffered, output block double-buffered.
        return 4 * (2 * TR * tk + 2 * tk * tn + 2 * TR * tn) <= budget

    # Mode A: TK = Np (whole W column panel per out-col tile) -> no K axis.
    for tn in _divisor_tiles(Np):
        if fits(Np, tn):
            return Np, tn, False
    # Mode B: tiled K with accumulation into the resident output block.
    for tk in _divisor_tiles(Np):
        for tn in _divisor_tiles(Np):
            if fits(tk, tn):
                return tk, tn, True
    return 128, 128, True  # always fits


# ----------------------------------------------------------------------------
# Forward.
# ----------------------------------------------------------------------------
def wpt1d_forward(x, J, dec_lo=BIOR44_DEC_LO, dec_hi=BIOR44_DEC_HI):
    """x: (B, C, N) float32 -> (B, C * 2**J, N // 2**J) float32."""
    B, C, N = x.shape
    assert N % (2 ** J) == 0, "L must be divisible by 2**J"
    # TODO(synk): the odd-length edge-duplication branch of afb1d is not
    # implemented (even lengths are enforced at every level here).

    Np = _round_up(N, 128)                      # lane-dense padded length
    W = _cached_composite_w(N, Np, J, tuple(dec_lo), tuple(dec_hi))

    R = B * C
    x2d = x.reshape(R, N).astype(jnp.float32)

    # Row tile: one big tile whenever B*C fits in a 1024-row tile; pad once.
    Rp8 = _round_up(R, 8)
    TR = Rp8 if Rp8 <= 1024 else 1024
    Rp = _round_up(R, TR)

    vmem_limit = _vmem_limit_bytes()
    budget = int(vmem_limit * 0.8)
    TK, TN, tiled_k = _select_tiles(TR, Np, budget)

    # v7x has 2 TensorCores: keep >= 2 parallel grid tiles when possible.
    if (Rp // TR) * (Np // TN) < 2 and TN >= 256:
        TN //= 2

    if (Rp, Np) != (R, N):
        xp = jnp.zeros((Rp, Np), jnp.float32).at[:R, :N].set(x2d)
    else:
        xp = x2d

    if tiled_k:
        grid = (Rp // TR, Np // TN, Np // TK)
        in_specs = [
            pl.BlockSpec((TR, TK), lambda i, j, k: (i, k)),   # signal rows
            pl.BlockSpec((TK, TN), lambda i, j, k: (k, j)),   # W block
        ]
        out_spec = pl.BlockSpec((TR, TN), lambda i, j, k: (i, j))
        kernel = _wpt_matmul_kernel_tiled_k
        dim_sem = ("parallel", "parallel", "arbitrary")
    else:
        grid = (Rp // TR, Np // TN)
        in_specs = [
            pl.BlockSpec((TR, Np), lambda i, j: (i, 0)),      # signal rows
            pl.BlockSpec((Np, TN), lambda i, j: (0, j)),      # W column panel
        ]
        out_spec = pl.BlockSpec((TR, TN), lambda i, j: (i, j))
        kernel = _wpt_matmul_kernel_full_k
        dim_sem = ("parallel", "parallel")

    out = pl.pallas_call(
        kernel,
        out_shape=jax.ShapeDtypeStruct((Rp, Np), jnp.float32),
        grid_spec=pltpu.PrefetchScalarGridSpec(
            num_scalar_prefetch=0,
            grid=grid,
            in_specs=in_specs,
            out_specs=out_spec,
        ),
        # TODO(synk): a bf16 hi/lo split of W (two dots, f32 accumulate) would
        # ~1.5-2x a compute-bound variant on v6e/v7x while keeping ~1e-6
        # accuracy; not adopted because typical shapes here are W-stream-bound.
        compiler_params=pltpu.CompilerParams(
            dimension_semantics=dim_sem,
            vmem_limit_bytes=vmem_limit,
        ),
    )(xp, W)

    out = out[:R, :N]
    return out.reshape(B, C, 2 ** J, N // (2 ** J)).reshape(
        B, C * (2 ** J), N // (2 ** J))


# ----------------------------------------------------------------------------
# Pure-JAX reference (direct periodized gather, cascaded per level,
# independent of the composite-matrix construction).
# ----------------------------------------------------------------------------
def _ref_level(x, dec_lo, dec_hi):
    B, C, N = x.shape
    L = len(dec_lo)
    L2 = L // 2
    N2 = N // 2
    n = np.arange(N2)
    lo = jnp.zeros((B, C, N2), jnp.float32)
    hi = jnp.zeros((B, C, N2), jnp.float32)
    for j in range(L):
        idx = (2 * n + L2 - j) % N
        xg = x[..., idx]
        lo = lo + jnp.float32(dec_lo[j]) * xg
        hi = hi + jnp.float32(dec_hi[j]) * xg
    return jnp.stack([lo, hi], axis=2).reshape(B, 2 * C, N2)


def wpt1d_reference(x, J, dec_lo=BIOR44_DEC_LO, dec_hi=BIOR44_DEC_HI):
    dec_lo = np.asarray(dec_lo, dtype=np.float64)
    dec_hi = np.asarray(dec_hi, dtype=np.float64)
    for _ in range(J):
        x = _ref_level(x, dec_lo, dec_hi)
    return x


if __name__ == "__main__":
    B, C, L, J = 2, 3, 512, 3
    key = jax.random.PRNGKey(0)
    x = jax.random.normal(key, (B, C, L), dtype=jnp.float32)

    out = jax.block_until_ready(wpt1d_forward(x, J))
    assert out.shape == (B, C * 2 ** J, L // 2 ** J), out.shape

    ref = jax.block_until_ready(wpt1d_reference(x, J))
    err = float(jnp.max(jnp.abs(out - ref)))
    assert err < 1e-4, f"max abs error {err}"

    # Second call exercises the cached-W path.
    out2 = jax.block_until_ready(wpt1d_forward(x, J))
    assert float(jnp.max(jnp.abs(out2 - out))) == 0.0

    print("KERNEL_OK")
</pallas_src>

<mosaic_0001>
module attributes {stable_mosaic.version = 11 : i64} {
  func.func @_wpt_matmul_kernel_full_k(%arg0: i32, %arg1: i32, %arg2: memref<8x512xf32, #tpu.memory_space<vmem>>, %arg3: memref<512x256xf32, #tpu.memory_space<vmem>>, %arg4: memref<8x256xf32, #tpu.memory_space<vmem>>) attributes {dimension_semantics = [#tpu.dimension_semantics<parallel>, #tpu.dimension_semantics<parallel>], iteration_bounds = array<i64: 1, 2>, scalar_prefetch = 0 : i64, scratch_operands = 0 : i64, tpu.core_type = #tpu.core_type<tc>, window_params = [{transform_indices = @transform_0, window_bounds = array<i64: 8, 512>}, {transform_indices = @transform_1, window_bounds = array<i64: 512, 256>}, {transform_indices = @transform_2, window_bounds = array<i64: 8, 256>}]} {
    %c0 = arith.constant 0 : index
    %c0_0 = arith.constant 0 : index
    %0 = vector.load %arg2[%c0, %c0_0] : memref<8x512xf32, #tpu.memory_space<vmem>>, vector<8x512xf32>
    %c0_1 = arith.constant 0 : index
    %c0_2 = arith.constant 0 : index
    %1 = vector.load %arg3[%c0_1, %c0_2] : memref<512x256xf32, #tpu.memory_space<vmem>>, vector<512x256xf32>
    %cst = arith.constant dense<0.000000e+00> : vector<8x256xf32>
    %2 = tpu.matmul %0, %1, %cst {dimension_numbers = #tpu.dot_dimension_numbers<[1], [0], [0], [1], [0, 0, 1, 1], [], []>} : vector<8x512xf32>, vector<512x256xf32>, vector<8x256xf32> -> vector<8x256xf32>
    %c0_3 = arith.constant 0 : index
    %c0_4 = arith.constant 0 : index
    %3 = vector.load %arg4[%c0_3, %c0_4] : memref<8x256xf32, #tpu.memory_space<vmem>>, vector<8x256xf32>
    tpu.vector_store %arg4[%c0_3, %c0_4], %2 {strides = array<i32>} : memref<8x256xf32, #tpu.memory_space<vmem>>, vector<8x256xf32>,
    return
  }
  func.func @transform_0(%arg0: i32, %arg1: i32) -> (i32, i32) {
    %c0_i32 = arith.constant 0 : i32
    %c0_i32_0 = arith.constant 0 : i32
    return %arg0, %c0_i32 : i32, i32
  }
  func.func @transform_1(%arg0: i32, %arg1: i32) -> (i32, i32) {
    %c0_i32 = arith.constant 0 : i32
    %c0_i32_0 = arith.constant 0 : i32
    return %c0_i32, %arg1 : i32, i32
  }
  func.func @transform_2(%arg0: i32, %arg1: i32) -> (i32, i32) {
    %c0_i32 = arith.constant 0 : i32
    return %arg0, %arg1 : i32, i32
  }
}

</mosaic_0001>

<bundles_post_ra>
// kernel: tpu_custom_call.1
= control target key start
LH: loop header
LB: loop body
LE: loop exit
PB: predicated region body
PF: predicated region fallthrough
CT: control target
= control target key end

     0   :  { %7 = vsyncpa [#allocation3], 0  ;;  %s1137_s0 = inlined_call_operand.hbm [shape: f32[8,512], index: 0, kind: input, shape index: {}]   ;;  %s1138_s1 = inlined_call_operand.hbm [shape: f32[512,512], index: 1, kind: input, shape index: {}]   ;;  %s1139_s2 = inlined_call_operand.hbm [shape: f32[8,512], index: 2, kind: output, shape index: {}]  }
   0x1   :  { %8 = vsyncpa [#allocation6], 0 }
   0x2   :  { %10 = vsyncpa [#allocation6 + $0x1], 0 }
   0x3   :  { %11 = vsyncpa [#allocation4], 0 }
   0x4   :  { %13 = vsyncpa [#allocation4 + $0x1], 0  ;;  %s843_s9 = smov 0   ;;  %s845_s10 = smov 0  }
   0x5   :  { %s847_s11 = smov 0   ;;  %s849_s12 = smov 0  }
   0x6   :  { %s851_s13 = smov 0   ;;  %s853_s14 = smov 0  }
   0x7 LB: > { %s587_s15 = sadd.s32 4294967295, %s820_s14   ;;  %s588_s16 = sadd.s32 4294967294, %s820_s14   ;;  %s820_s14 = sphi %s853_s14, %s19_s14   ;;  %s816_s13 = sphi %s851_s13, %s1158_s13   ;;  %s812_s12 = sphi %s849_s12, %s1157_s12   ;;  %s808_s11 = sphi %s847_s11, %s1156_s11   ;;  %s804_s10 = sphi %s845_s10, %s1155_s10   ;;  %s800_s9 = sphi %s843_s9, %s1154_s9  }
   0x8   : > { %s64_s17 = sadd.s32 1, %s808_s11  ;;  %p71_p0 = scmp.ne.s32.totalorder %s808_s11, %s804_s10 }
   0x9   : > { %p72_p1 = scmp.eq.s32.totalorder %s820_s14, 0  ;;  %p77_p2 = scmp.ne.s32.totalorder %s804_s10, %s800_s9 }
   0xa   : > { %p881_p3 = scmp.eq.s32.totalorder %s587_s15, 0  ;;  %p103_p4 = scmp.eq.s32.totalorder %s587_s15, 1 }
   0xb   : > { %p885_p5 = por %p72_p1, %p71_p0  ;;  %p109_p6 = scmp.eq.s32.totalorder %s588_s16, 1 }
   0xc   : > { %p891_p7 = por %p881_p3, %p77_p2  ;;  %p895_p8 = por %p103_p4, %p71_p0 }
   0xd   : > { %p899_p9 = por %p109_p6, %p77_p2  ;;  %p589_p10 = scmp.ge.s32.totalorder %s820_s14, 1 }
   0xe   : > { %s1144_s20 = scalar_select %p891_p7, 1, 0 }
   0xf   : > { %s1145_s21 = scalar_select %p895_p8, 1, 0 }
  0x10   : > { %s1146_s22 = scalar_select %p899_p9, 1, 0 }
  0x11   : > { %p116_p11 = scmp.lt.s32.totalorder %s820_s14, 3  ;;  %s822_s24 = smov [#allocation2]  }
  0x12   : > { %s132_s25 = sshll.u32 %s822_s24, 4  ;;  %p627_p1 = scmp.lt.s32.totalorder %s820_s14, 2  ;;  %s133_s25 = int_to_ptr.vmem [resolvable:$true] %s132_s25 }
  0x13   : > { %p906_p13 = pnand %p589_p10, %p116_p11  ;;  %s28_s28 = sadd.s32 1, %s816_s13 }
  0x14   : > { %p915_p4 = pnand %p627_p1, %p885_p5  ;;  %p29_p6 = scmp.ge.s32.totalorder %s28_s28, 2 }
  0x15   : > { %p614_p0 = pneg %p906_p13  ;;  %s143_s29 = sand.u32 1, %s808_s11  }
  0x16   : > { %s693_s30 = scalar_lea.vmem %s133_s25, 512  ;;  %p701_p8 = scmp.lt.s32.totalorder %s133_s25, %s133_s25 }
  0x17   : > { %p921_p2 = pnand %p614_p0, %p881_p3  ;;  %p694_p11 = scmp.ne.s32.totalorder %s133_s25, %s693_s30 }
  0x18   : > { %p702_p5 = scmp.lt.s32.totalorder %s693_s30, %s693_s30 }
  0x19   : > { %p684_p10 = pneg %p921_p2 }
  0x1a   : > { %p703_p1 = por %p702_p5, %p701_p8 }
  0x1b   : > { %p696_p12 = pnand %p694_p11, %p684_p10 }
  0x1d   : > { %p697_p9 = pneg %p696_p12 }
  0x1f   : > { %p704_p7 = pnand %p703_p1, %p697_p9 }
  0x21   : > { %707 = shalt.err (!%p704_p7)
}
  0x22   : > { %617 = dma.hbm_to_vmem [thread:$0]  (!%p921_p2), %s1137_s0, 512, %s133_s25, [#allocation3]  }
  0x23   : > { %s1160_s28 = smov (%p29_p6, %s28_s28), 0  ;;  %s592_s5 = sshll.u32 %s143_s29, 10 }
  0x24   : > { %s61_s6 = ssub.s32 %s816_s13, %s1160_s28  ;;  %s604_s7 = sshll.u32 %s816_s13, 8 }
  0x25   : > { %p62_p12 = scmp.eq.s32.totalorder %s61_s6, 0  ;;  %s153_s16 = scalar_lea.hbm %s1138_s1, %s604_s7 }
  0x26   : > { %s147_s19 = scalar_lea.vmem [#allocation5], %s592_s5  ;;  %s144_s30 = scalar_lea.sflag [#allocation6], %s143_s29 }
  0x27   : > { %s154_s24 = sshll.u32 %s147_s19, 4  ;;  %p710_p7 = pneg %p915_p4  ;;  %s155_s24 = int_to_ptr.vmem [resolvable:$true] %s154_s24 }
  0x28   : > { %s945_s27 = scalar_select %p62_p12, %s808_s11, %s64_s17  }
  0x29   : > { %s721_s25 = scalar_lea.vmem %s155_s24, 16384  ;;  %s823_s3 = smov [#allocation5]  }
  0x2a   : > { %p722_p8 = scmp.ne.s32.totalorder %s155_s24, %s721_s25  ;;  %s726_s4 = sshll.u32 %s823_s3, 4  ;;  %s727_s4 = int_to_ptr.vmem [resolvable:$false] %s726_s4 }
  0x2b   : > { %s728_s6 = scalar_lea.vmem %s727_s4, 32768  ;;  %p729_p2 = scmp.lt.s32.totalorder %s155_s24, %s727_s4 }
  0x2c   : > { %p724_p9 = pnand %p722_p8, %p710_p7  ;;  %p730_p6 = scmp.lt.s32.totalorder %s728_s6, %s721_s25 }
  0x2e   : > { %p725_p0 = pneg %p724_p9  ;;  %p731_p10 = por %p730_p6, %p729_p2 }
  0x30   : > { %p732_p11 = pnand %p731_p10, %p725_p0 }
  0x32   : > { %735 = shalt.err (!%p732_p11)
}
  0x33   : > { %s824_s5 = smov 512   ;;  %s825_s17 = smov 256  }
  0x34   : > { %s826_s7 = smov 16   ;;  %166 = sbr.rel (%p906_p13) target bundleno = 339 (0x153), region = 28 }
  0x35   : > { %621 = dma.hbm_to_vmem [thread:$0]  (!%p915_p4), %s153_s16, 16384, %s155_s24, %s144_s30, %s824_s5, %s825_s17, %s826_s7  }
  0x39   : > { %787 = dma.done.wait (%p881_p3), [#allocation3], 512  }
  0x3a   : > { %789 = vsyncadd (%p881_p3), [#allocation3], 4294966784  ;;  %s958_s29 = sand.u32 1, %s804_s10   ;;  %p1150_p4 = scmp.ne.s32.totalorder %s1144_s20, 0 }
  0x3b   : > { %s597_s8 = sshll.u32 %s958_s29, 10  ;;  %s173_s15 = scalar_lea.sflag [#allocation6], %s958_s29 }
  0x3c   : > { %s962_s19 = scalar_lea.vmem [#allocation5], %s597_s8 }
  0x3d   : > { %791 = dma.done.wait (%p1150_p4), %s173_s15, 16384  }
  0x3e   : > { %793 = vsyncadd (%p1150_p4), %s173_s15, 4294950912  ;;  %v234_v0 = vld [vmem:[%s962_s19 + $0xf8] sm:$0xff]  ;;  %v233_v2 = vld [vmem:[%s962_s19 + $0xf0] sm:$0xff]  ;;  %s598_s18 = sshll.u32 %s958_s29, 4  ;;  %s605_s20 = sshll.u32 %s812_s12, 8 }
  0x3f   : > { %v298_v1 = vld [vmem:[%s962_s19 + $0x2f8] sm:$0xff]  ;;  %331 = vmatprep.subr.mxu0 %v234_v0  ;;  %v297_v3 = vld [vmem:[%s962_s19 + $0x2f0] sm:$0xff]  ;;  %v232_v4 = vld [vmem:[%s962_s19 + $0xe8] sm:$0xff]  ;;  %s196_s23 = scalar_lea.vmem [#allocation7], %s598_s18  ;;  %s490_s30 = scalar_lea.hbm %s1139_s2, %s605_s20 }
  0x40   : > { %402 = vmatprep.subr.mxu1 %v298_v1  ;;  %v296_v5 = vld [vmem:[%s962_s19 + $0x2e8] sm:$0xff]  ;;  %332 = vmatpush1.msra.mxu0 %v233_v2  ;;  %v231_v6 = vld [vmem:[%s962_s19 + $0xe0] sm:$0xff]  ;;  %v230_v8 = vld [vmem:[%s962_s19 + $0xd8] sm:$0xff]  ;;  %s492_s26 = sshll.u32 %s196_s23, 4  ;;  %s476_s25 = scalar_lea.sflag [#allocation4], %s958_s29  ;;  %s493_s26 = int_to_ptr.vmem [resolvable:$true] %s492_s26 }
  0x41   : > { %403 = vmatpush1.msra.mxu1 %v297_v3  ;;  %v295_v7 = vld [vmem:[%s962_s19 + $0x2e0] sm:$0xff]  ;;  %333 = vmatprep.subr.mxu0 %v232_v4  ;;  %v294_v9 = vld [vmem:[%s962_s19 + $0x2d8] sm:$0xff]  ;;  %v229_v10 = vld [vmem:[%s962_s19 + $0xd0] sm:$0xff]  ;;  %s736_s3 = scalar_lea.vmem %s493_s26, 256  ;;  %p1151_p13 = scmp.ne.s32.totalorder %s1145_s21, 0 }
  0x42   : > { %404 = vmatprep.subr.mxu1 %v296_v5  ;;  %v293_v11 = vld [vmem:[%s962_s19 + $0x2d0] sm:$0xff]  ;;  %334 = vmatpush1.msra.mxu0 %v231_v6  ;;  %v228_v12 = vld [vmem:[%s962_s19 + $0xc8] sm:$0xff]  ;;  %v227_v14 = vld [vmem:[%s962_s19 + $0xc0] sm:$0xff]  ;;  %p737_p3 = scmp.ne.s32.totalorder %s493_s26, %s736_s3  ;;  %s827_s12 = smov [#allocation7]  }
  0x43   : > { %405 = vmatpush1.msra.mxu1 %v295_v7  ;;  %v292_v13 = vld [vmem:[%s962_s19 + $0x2c8] sm:$0xff]  ;;  %335 = vmatprep.subr.mxu0 %v230_v8  ;;  %v291_v15 = vld [vmem:[%s962_s19 + $0x2c0] sm:$0xff]  ;;  %v226_v16 = vld [vmem:[%s962_s19 + $0xb8] sm:$0xff]  ;;  %s740_s4 = sshll.u32 %s827_s12, 4  ;;  %s741_s4 = int_to_ptr.vmem [resolvable:$false] %s740_s4 }
  0x44   : > { %406 = vmatprep.subr.mxu1 %v294_v9  ;;  %336 = vmatpush1.msra.mxu0 %v229_v10  ;;  %v290_v17 = vld [vmem:[%s962_s19 + $0x2b8] sm:$0xff]  ;;  %v225_v18 = vld [vmem:[%s962_s19 + $0xb0] sm:$0xff]  ;;  %v224_v20 = vld [vmem:[%s962_s19 + $0xa8] sm:$0xff]  ;;  %p738_p5 = pnand %p737_p3, %p1151_p13  ;;  %s742_s6 = scalar_lea.vmem %s741_s4, 512 }
  0x45   : > { %407 = vmatpush1.msra.mxu1 %v293_v11  ;;  %337 = vmatprep.subr.mxu0 %v228_v12  ;;  %v289_v19 = vld [vmem:[%s962_s19 + $0x2b0] sm:$0xff]  ;;  %v288_v21 = vld [vmem:[%s962_s19 + $0x2a8] sm:$0xff]  ;;  %v223_v22 = vld [vmem:[%s962_s19 + $0xa0] sm:$0xff]  ;;  %p743_p12 = scmp.lt.s32.totalorder %s493_s26, %s741_s4  ;;  %p744_p7 = scmp.lt.s32.totalorder %s742_s6, %s736_s3 }
  0x46   : > { %408 = vmatprep.subr.mxu1 %v292_v13  ;;  %338 = vmatpush1.msra.mxu0 %v227_v14  ;;  %v287_v23 = vld [vmem:[%s962_s19 + $0x2a0] sm:$0xff]  ;;  %v222_v24 = vld [vmem:[%s962_s19 + $0x98] sm:$0xff]  ;;  %v221_v26 = vld [vmem:[%s962_s19 + $0x90] sm:$0xff]  ;;  %p739_p1 = pneg %p738_p5 }
  0x47   : > { %409 = vmatpush1.msra.mxu1 %v291_v15  ;;  %339 = vmatprep.subr.mxu0 %v226_v16  ;;  %v286_v25 = vld [vmem:[%s962_s19 + $0x298] sm:$0xff]  ;;  %v285_v27 = vld [vmem:[%s962_s19 + $0x290] sm:$0xff]  ;;  %v220_v28 = vld [vmem:[%s962_s19 + $0x88] sm:$0xff]  ;;  %p745_p8 = por %p744_p7, %p743_p12 }
  0x48   : > { %410 = vmatprep.subr.mxu1 %v290_v17  ;;  %340 = vmatpush1.msra.mxu0 %v225_v18  ;;  %v284_v29 = vld [vmem:[%s962_s19 + $0x288] sm:$0xff]  ;;  %v219_v30 = vld [vmem:[%s962_s19 + $0x80] sm:$0xff]  ;;  %v218_v32 = vld [vmem:[%s962_s19 + $0x78] sm:$0xff] }
  0x49   : > { %411 = vmatpush1.msra.mxu1 %v289_v19  ;;  %341 = vmatprep.subr.mxu0 %v224_v20  ;;  %v283_v31 = vld [vmem:[%s962_s19 + $0x280] sm:$0xff]  ;;  %v282_v33 = vld [vmem:[%s962_s19 + $0x278] sm:$0xff]  ;;  %v217_v34 = vld [vmem:[%s962_s19 + $0x70] sm:$0xff]  ;;  %p746_p9 = pnand %p745_p8, %p739_p1 }
  0x4a   : > { %412 = vmatprep.subr.mxu1 %v288_v21  ;;  %342 = vmatpush1.msra.mxu0 %v223_v22  ;;  %v281_v35 = vld [vmem:[%s962_s19 + $0x270] sm:$0xff]  ;;  %v216_v36 = vld [vmem:[%s962_s19 + $0x68] sm:$0xff]  ;;  %v215_v38 = vld [vmem:[%s962_s19 + $0x60] sm:$0xff] }
  0x4b   : > { %413 = vmatpush1.msra.mxu1 %v287_v23  ;;  %343 = vmatprep.subr.mxu0 %v222_v24  ;;  %v280_v37 = vld [vmem:[%s962_s19 + $0x268] sm:$0xff]  ;;  %v279_v39 = vld [vmem:[%s962_s19 + $0x260] sm:$0xff]  ;;  %v214_v40 = vld [vmem:[%s962_s19 + $0x58] sm:$0xff] }
  0x4c   : > { %414 = vmatprep.subr.mxu1 %v286_v25  ;;  %344 = vmatpush1.msra.mxu0 %v221_v26  ;;  %v278_v41 = vld [vmem:[%s962_s19 + $0x258] sm:$0xff]  ;;  %v213_v42 = vld [vmem:[%s962_s19 + $0x50] sm:$0xff]  ;;  %v212_v44 = vld [vmem:[%s962_s19 + $0x48] sm:$0xff] }
  0x4d   : > { %415 = vmatpush1.msra.mxu1 %v285_v27  ;;  %345 = vmatprep.subr.mxu0 %v220_v28  ;;  %v277_v43 = vld [vmem:[%s962_s19 + $0x250] sm:$0xff]  ;;  %v276_v45 = vld [vmem:[%s962_s19 + $0x248] sm:$0xff]  ;;  %v211_v46 = vld [vmem:[%s962_s19 + $0x40] sm:$0xff] }
  0x4e   : > { %416 = vmatprep.subr.mxu1 %v284_v29  ;;  %346 = vmatpush1.msra.mxu0 %v219_v30  ;;  %v275_v47 = vld [vmem:[%s962_s19 + $0x240] sm:$0xff]  ;;  %v210_v48 = vld [vmem:[%s962_s19 + $0x38] sm:$0xff]  ;;  %v209_v50 = vld [vmem:[%s962_s19 + $0x30] sm:$0xff] }
  0x4f   : > { %417 = vmatpush1.msra.mxu1 %v283_v31  ;;  %347 = vmatprep.subr.mxu0 %v218_v32  ;;  %v274_v49 = vld [vmem:[%s962_s19 + $0x238] sm:$0xff]  ;;  %v273_v51 = vld [vmem:[%s962_s19 + $0x230] sm:$0xff]  ;;  %v208_v52 = vld [vmem:[%s962_s19 + $0x28] sm:$0xff] }
  0x50   : > { %418 = vmatprep.subr.mxu1 %v282_v33  ;;  %348 = vmatpush1.msra.mxu0 %v217_v34  ;;  %v272_v53 = vld [vmem:[%s962_s19 + $0x228] sm:$0xff]  ;;  %v207_v54 = vld [vmem:[%s962_s19 + $0x20] sm:$0xff]  ;;  %v206_v56 = vld [vmem:[%s962_s19 + $0x18] sm:$0xff] }
  0x51   : > { %419 = vmatpush1.msra.mxu1 %v281_v35  ;;  %349 = vmatprep.subr.mxu0 %v216_v36  ;;  %v271_v55 = vld [vmem:[%s962_s19 + $0x220] sm:$0xff]  ;;  %v270_v57 = vld [vmem:[%s962_s19 + $0x218] sm:$0xff]  ;;  %v205_v58 = vld [vmem:[%s962_s19 + $0x10] sm:$0xff] }
  0x52   : > { %420 = vmatprep.subr.mxu1 %v280_v37  ;;  %350 = vmatpush1.msra.mxu0 %v215_v38  ;;  %v269_v59 = vld [vmem:[%s962_s19 + $0x210] sm:$0xff]  ;;  %v204_v60 = vld [vmem:[%s962_s19 + $0x8] sm:$0xff]  ;;  %v203_v62 = vld [vmem:[%s962_s19] sm:$0xff] }
  0x53   : > { %421 = vmatpush1.msra.mxu1 %v279_v39  ;;  %351 = vmatprep.subr.mxu0 %v214_v40  ;;  %v268_v61 = vld [vmem:[%s962_s19 + $0x208] sm:$0xff]  ;;  %v267_v63 = vld [vmem:[%s962_s19 + $0x200] sm:$0xff]  ;;  %v266_v0 = vld [vmem:[%s962_s19 + $0x1f8] sm:$0xff] }
  0x54   : > { %422 = vmatprep.subr.mxu1 %v278_v41  ;;  %352 = vmatpush1.msra.mxu0 %v213_v42  ;;  %v330_v1 = vld [vmem:[%s962_s19 + $0x3f8] sm:$0xff]  ;;  %v265_v2 = vld [vmem:[%s962_s19 + $0x1f0] sm:$0xff]  ;;  %v264_v4 = vld [vmem:[%s962_s19 + $0x1e8] sm:$0xff] }
  0x55   : > { %423 = vmatpush1.msra.mxu1 %v277_v43  ;;  %353 = vmatprep.subr.mxu0 %v212_v44  ;;  %v329_v3 = vld [vmem:[%s962_s19 + $0x3f0] sm:$0xff]  ;;  %v328_v5 = vld [vmem:[%s962_s19 + $0x3e8] sm:$0xff]  ;;  %v263_v6 = vld [vmem:[%s962_s19 + $0x1e0] sm:$0xff] }
  0x56   : > { %424 = vmatprep.subr.mxu1 %v276_v45  ;;  %354 = vmatpush1.msra.mxu0 %v211_v46  ;;  %v327_v7 = vld [vmem:[%s962_s19 + $0x3e0] sm:$0xff]  ;;  %v262_v8 = vld [vmem:[%s962_s19 + $0x1d8] sm:$0xff]  ;;  %v261_v10 = vld [vmem:[%s962_s19 + $0x1d0] sm:$0xff] }
  0x57   : > { %425 = vmatpush1.msra.mxu1 %v275_v47  ;;  %355 = vmatprep.subr.mxu0 %v210_v48  ;;  %v326_v9 = vld [vmem:[%s962_s19 + $0x3d8] sm:$0xff]  ;;  %v325_v11 = vld [vmem:[%s962_s19 + $0x3d0] sm:$0xff]  ;;  %v260_v12 = vld [vmem:[%s962_s19 + $0x1c8] sm:$0xff] }
  0x58   : > { %426 = vmatprep.subr.mxu1 %v274_v49  ;;  %356 = vmatpush1.msra.mxu0 %v209_v50  ;;  %v324_v13 = vld [vmem:[%s962_s19 + $0x3c8] sm:$0xff]  ;;  %v259_v14 = vld [vmem:[%s962_s19 + $0x1c0] sm:$0xff]  ;;  %v258_v16 = vld [vmem:[%s962_s19 + $0x1b8] sm:$0xff] }
  0x59   : > { %427 = vmatpush1.msra.mxu1 %v273_v51  ;;  %357 = vmatprep.subr.mxu0 %v208_v52  ;;  %v323_v15 = vld [vmem:[%s962_s19 + $0x3c0] sm:$0xff]  ;;  %v322_v17 = vld [vmem:[%s962_s19 + $0x3b8] sm:$0xff]  ;;  %v257_v18 = vld [vmem:[%s962_s19 + $0x1b0] sm:$0xff] }
  0x5a   : > { %428 = vmatprep.subr.mxu1 %v272_v53  ;;  %358 = vmatpush1.msra.mxu0 %v207_v54  ;;  %v321_v19 = vld [vmem:[%s962_s19 + $0x3b0] sm:$0xff]  ;;  %v256_v20 = vld [vmem:[%s962_s19 + $0x1a8] sm:$0xff]  ;;  %v255_v22 = vld [vmem:[%s962_s19 + $0x1a0] sm:$0xff] }
  0x5b   : > { %429 = vmatpush1.msra.mxu1 %v271_v55  ;;  %359 = vmatprep.subr.mxu0 %v206_v56  ;;  %v320_v21 = vld [vmem:[%s962_s19 + $0x3a8] sm:$0xff]  ;;  %v319_v23 = vld [vmem:[%s962_s19 + $0x3a0] sm:$0xff]  ;;  %v254_v24 = vld [vmem:[%s962_s19 + $0x198] sm:$0xff] }
  0x5c   : > { %430 = vmatprep.subr.mxu1 %v270_v57  ;;  %360 = vmatpush1.msra.mxu0 %v205_v58  ;;  %v318_v25 = vld [vmem:[%s962_s19 + $0x398] sm:$0xff]  ;;  %v253_v26 = vld [vmem:[%s962_s19 + $0x190] sm:$0xff]  ;;  %v252_v28 = vld [vmem:[%s962_s19 + $0x188] sm:$0xff] }
  0x5d   : > { %431 = vmatpush1.msra.mxu1 %v269_v59  ;;  %361 = vmatprep.subr.mxu0 %v204_v60  ;;  %v317_v27 = vld [vmem:[%s962_s19 + $0x390] sm:$0xff]  ;;  %v316_v29 = vld [vmem:[%s962_s19 + $0x388] sm:$0xff]  ;;  %v251_v30 = vld [vmem:[%s962_s19 + $0x180] sm:$0xff] }
  0x5e   : > { %432 = vmatprep.subr.mxu1 %v268_v61  ;;  %362 = vmatpush1.msra.mxu0 %v203_v62  ;;  %v315_v31 = vld [vmem:[%s962_s19 + $0x380] sm:$0xff]  ;;  %v250_v32 = vld [vmem:[%s962_s19 + $0x178] sm:$0xff]  ;;  %v249_v34 = vld [vmem:[%s962_s19 + $0x170] sm:$0xff] }
  0x5f   : > { %433 = vmatpush1.msra.mxu1 %v267_v63  ;;  %363 = vmatprep.subr.mxu0 %v266_v0  ;;  %v314_v33 = vld [vmem:[%s962_s19 + $0x378] sm:$0xff]  ;;  %v313_v35 = vld [vmem:[%s962_s19 + $0x370] sm:$0xff]  ;;  %v248_v36 = vld [vmem:[%s962_s19 + $0x168] sm:$0xff] }
  0x60   : > { %434 = vmatprep.subr.mxu1 %v330_v1  ;;  %364 = vmatpush2.msra.mxu0 %v265_v2  ;;  %v312_v37 = vld [vmem:[%s962_s19 + $0x368] sm:$0xff]  ;;  %v247_v38 = vld [vmem:[%s962_s19 + $0x160] sm:$0xff]  ;;  %v246_v40 = vld [vmem:[%s962_s19 + $0x158] sm:$0xff] }
  0x61   : > { %435 = vmatpush2.msra.mxu1 %v329_v3  ;;  %365 = vmatprep.subr.mxu0 %v264_v4  ;;  %v311_v39 = vld [vmem:[%s962_s19 + $0x360] sm:$0xff]  ;;  %v310_v41 = vld [vmem:[%s962_s19 + $0x358] sm:$0xff]  ;;  %v245_v42 = vld [vmem:[%s962_s19 + $0x150] sm:$0xff] }
  0x62   : > { %436 = vmatprep.subr.mxu1 %v328_v5  ;;  %366 = vmatpush2.msra.mxu0 %v263_v6  ;;  %v309_v43 = vld [vmem:[%s962_s19 + $0x350] sm:$0xff]  ;;  %v244_v44 = vld [vmem:[%s962_s19 + $0x148] sm:$0xff]  ;;  %v243_v46 = vld [vmem:[%s962_s19 + $0x140] sm:$0xff] }
  0x63   : > { %437 = vmatpush2.msra.mxu1 %v327_v7  ;;  %367 = vmatprep.subr.mxu0 %v262_v8  ;;  %v308_v45 = vld [vmem:[%s962_s19 + $0x348] sm:$0xff]  ;;  %v307_v47 = vld [vmem:[%s962_s19 + $0x340] sm:$0xff]  ;;  %v242_v48 = vld [vmem:[%s962_s19 + $0x138] sm:$0xff] }
  0x64   : > { %438 = vmatprep.subr.mxu1 %v326_v9  ;;  %368 = vmatpush2.msra.mxu0 %v261_v10  ;;  %v306_v49 = vld [vmem:[%s962_s19 + $0x338] sm:$0xff]  ;;  %v241_v50 = vld [vmem:[%s962_s19 + $0x130] sm:$0xff]  ;;  %v240_v52 = vld [vmem:[%s962_s19 + $0x128] sm:$0xff] }
  0x65   : > { %439 = vmatpush2.msra.mxu1 %v325_v11  ;;  %369 = vmatprep.subr.mxu0 %v260_v12  ;;  %v305_v51 = vld [vmem:[%s962_s19 + $0x330] sm:$0xff]  ;;  %v304_v53 = vld [vmem:[%s962_s19 + $0x328] sm:$0xff]  ;;  %v239_v54 = vld [vmem:[%s962_s19 + $0x120] sm:$0xff] }
  0x66   : > { %440 = vmatprep.subr.mxu1 %v324_v13  ;;  %370 = vmatpush2.msra.mxu0 %v259_v14  ;;  %v303_v55 = vld [vmem:[%s962_s19 + $0x320] sm:$0xff]  ;;  %v238_v56 = vld [vmem:[%s962_s19 + $0x118] sm:$0xff]  ;;  %v237_v58 = vld [vmem:[%s962_s19 + $0x110] sm:$0xff] }
  0x67   : > { %441 = vmatpush2.msra.mxu1 %v323_v15  ;;  %371 = vmatprep.subr.mxu0 %v258_v16  ;;  %v302_v57 = vld [vmem:[%s962_s19 + $0x318] sm:$0xff]  ;;  %v301_v59 = vld [vmem:[%s962_s19 + $0x310] sm:$0xff]  ;;  %v236_v60 = vld [vmem:[%s962_s19 + $0x108] sm:$0xff] }
  0x68   : > { %442 = vmatprep.subr.mxu1 %v322_v17  ;;  %372 = vmatpush2.msra.mxu0 %v257_v18  ;;  %v300_v61 = vld [vmem:[%s962_s19 + $0x308] sm:$0xff]  ;;  %v235_v62 = vld [vmem:[%s962_s19 + $0x100] sm:$0xff]  ;;  %v202_v1 = vld [vmem:[#allocation2 + $0x18] sm:$0xff] }
  0x69   : > { %443 = vmatpush2.msra.mxu1 %v321_v19  ;;  %373 = vmatprep.subr.mxu0 %v256_v20  ;;  %v200_v63 = vld [vmem:[#allocation2 + $0x8] sm:$0xff]  ;;  %v299_v0 = vld [vmem:[%s962_s19 + $0x300] sm:$0xff]  ;;  %v201_v3 = vld [vmem:[#allocation2 + $0x10] sm:$0xff] }
  0x6a   : > { %444 = vmatprep.subr.mxu1 %v320_v21  ;;  %374 = vmatpush2.msra.mxu0 %v255_v22  ;;  %v199_v2 = vld [vmem:[#allocation2] sm:$0xff] }
  0x6b   : > { %445 = vmatpush2.msra.mxu1 %v319_v23  ;;  %375 = vmatprep.subr.mxu0 %v254_v24 }
  0x6c   : > { %446 = vmatprep.subr.mxu1 %v318_v25  ;;  %376 = vmatpush2.msra.mxu0 %v253_v26 }
  0x6d   : > { %447 = vmatpush2.msra.mxu1 %v317_v27  ;;  %377 = vmatprep.subr.mxu0 %v252_v28 }
  0x6e   : > { %448 = vmatprep.subr.mxu1 %v316_v29  ;;  %378 = vmatpush2.msra.mxu0 %v251_v30 }
  0x6f   : > { %449 = vmatpush2.msra.mxu1 %v315_v31  ;;  %379 = vmatprep.subr.mxu0 %v250_v32 }
  0x70   : > { %450 = vmatprep.subr.mxu1 %v314_v33  ;;  %380 = vmatpush2.msra.mxu0 %v249_v34 }
  0x71   : > { %451 = vmatpush2.msra.mxu1 %v313_v35  ;;  %381 = vmatprep.subr.mxu0 %v248_v36 }
  0x72   : > { %452 = vmatprep.subr.mxu1 %v312_v37  ;;  %382 = vmatpush2.msra.mxu0 %v247_v38 }
  0x73   : > { %453 = vmatpush2.msra.mxu1 %v311_v39  ;;  %383 = vmatprep.subr.mxu0 %v246_v40 }
  0x74   : > { %454 = vmatprep.subr.mxu1 %v310_v41  ;;  %384 = vmatpush2.msra.mxu0 %v245_v42 }
  0x75   : > { %455 = vmatpush2.msra.mxu1 %v309_v43  ;;  %385 = vmatprep.subr.mxu0 %v244_v44 }
  0x76   : > { %456 = vmatprep.subr.mxu1 %v308_v45  ;;  %386 = vmatpush2.msra.mxu0 %v243_v46 }
  0x77   : > { %457 = vmatpush2.msra.mxu1 %v307_v47  ;;  %387 = vmatprep.subr.mxu0 %v242_v48 }
  0x78   : > { %458 = vmatprep.subr.mxu1 %v306_v49  ;;  %388 = vmatpush2.msra.mxu0 %v241_v50 }
  0x79   : > { %459 = vmatpush2.msra.mxu1 %v305_v51  ;;  %389 = vmatprep.subr.mxu0 %v240_v52 }
  0x7a   : > { %460 = vmatprep.subr.mxu1 %v304_v53  ;;  %390 = vmatpush2.msra.mxu0 %v239_v54 }
  0x7b   : > { %461 = vmatpush2.msra.mxu1 %v303_v55  ;;  %391 = vmatprep.subr.mxu0 %v238_v56 }
  0x7c   : > { %462 = vmatprep.subr.mxu1 %v302_v57  ;;  %392 = vmatpush2.msra.mxu0 %v237_v58 }
  0x7d   : > { %463 = vmatpush2.msra.mxu1 %v301_v59  ;;  %393 = vmatprep.subr.mxu0 %v236_v60 }
  0x7e   : > { %464 = vmatprep.subr.mxu1 %v300_v61  ;;  %394 = vmatpush2.msra.mxu0 %v235_v62 }
  0x7f   : > { %395 = vmatprep.mubr.f32.mxu0 %v200_v63  ;;  %465 = vmatpush2.msra.mxu1 %v299_v0 }
  0x80   : > { %466 = vmatprep.mubr.f32.mxu1 %v202_v1  ;;  %396 = vmatmul.mubr.f32.vlgmr.msra.gmra.mxu0 %v199_v2 }
  0x81   : > { %467 = vmatmul.mubr.f32.vlgmr.msra.gmra.mxu1 %v201_v3 }
 0x140   : > { %v397_v4 = vpop.f32.mrf.mxu0 }
 0x141   : > { %v468_v5 = vpop.f32.mrf.mxu1 }
 0x142   : > { %v469_v6 = vadd.f32 %v468_v5, %v397_v4  ;;  %v399_v7 = vpop.f32.mrf.mxu0 }
 0x143   : > { %v470_v8 = vpop.f32.mrf.mxu1 }
 0x144   : > { %473 = vst [vmem:[%s196_s23] sm:$0xff] %v469_v6  ;;  %v471_v9 = vadd.f32 %v470_v8, %v399_v7 }
 0x146   : > { %474 = vst [vmem:[%s196_s23 + $0x8] sm:$0xff] %v471_v9 }
 0x147   : > { %749 = shalt.err (!%p746_p9)
}
 0x148   : > { %s750_s5 = scalar_lea.hbm %s490_s30, 256  ;;  %s754_s29 = scalar_lea.hbm %s1139_s2, 512 }
 0x149   : > { %p751_p0 = scmp.ne.s32.totalorder %s490_s30, %s750_s5  ;;  %p755_p10 = scmp.lt.s32.totalorder %s490_s30, %s1139_s2 }
 0x14a   : > { %p756_p11 = scmp.lt.s32.totalorder %s754_s29, %s750_s5 }
 0x14b   : > { %p752_p2 = pnand %p751_p0, %p1151_p13 }
 0x14c   : > { %p757_p4 = por %p756_p11, %p755_p10 }
 0x14d   : > { %p753_p6 = pneg %p752_p2 }
 0x14f   : > { %p758_p3 = pnand %p757_p4, %p753_p6 }
 0x151   : > { %761 = shalt.err (!%p758_p3)
}
 0x152   : > { %612 = dma.vmem_to_hbm [thread:$0]  (%p1151_p13), %s493_s26, 256, %s490_s30, %s476_s25  }
 0x153 PF: > { %s504_s19 = sand.u32 1, %s800_s9   ;;  %p1152_p5 = scmp.ne.s32.totalorder %s1146_s22, 0 }
 0x154   : > { %p1153_p1 = scmp.ge.s32.totalorder %s820_s14, 2  ;;  %s505_s18 = scalar_lea.sflag [#allocation4], %s504_s19 }
 0x156   : > { %p623_p12 = pnand %p1153_p1, %p1152_p5 }
 0x158   : > { %p624_p7 = pneg %p623_p12 }
 0x15a   : > { %795 = dma.done.wait (%p624_p7), %s505_s18, 256  }
 0x15b   : > { %797 = vsyncadd (%p624_p7), %s505_s18, 4294967040  ;;  %s19_s14 = sadd.s32 1, %s820_s14   ;;  %s1154_s9 = smov %s804_s10 }
 0x15c   : > { %p16_p8 = scmp.ge.s32.totalorder %s19_s14, 4   ;;  %s1155_s10 = smov %s808_s11 }
 0x15d   : > { %s1156_s11 = smov %s945_s27  ;;  %s1157_s12 = smov %s816_s13 }
 0x15e   : > { %s1158_s13 = smov %s1160_s28  ;;  %18 = sbr.rel (!%p16_p8) target bundleno = 7 (0x7), region = 79 }
 0x163   :  { %510 = vsyncpa [#allocation3], 1 }
 0x164   :  { %512 = vsyncpa [#allocation3 + $0x1], 1 }
 0x165   :  { %513 = vsyncpa [#allocation6], 1 }
 0x166   :  { %515 = vsyncpa [#allocation6 + $0x1], 1 }
 0x167   :  { %516 = vsyncpa [#allocation4], 1 }
 0x168   :  { %518 = vsyncpa [#allocation4 + $0x1], 1 }

</bundles_post_ra>
